<compile_context>
chip_gen: v7x
topology: tpu7x:2x2x1
jax: 0.10.0
libtpu: 0.0.40
codegen_flags: <defaults>
</compile_context>

<pallas_src>
import jax
import jax.numpy as jnp
from jax.experimental import pallas as pl
from jax.experimental.pallas import tpu as pltpu


_LANE_TILE_TARGET = 256 * 1024  # lanes per spatial tile (f32: ~3 MiB per 3-chan tile)


def _make_minmax_kernel(lane_tile, hw):
    """Streaming per-channel global min/max over (B, 3, HW) in (1,3,T) tiles."""
    needs_mask = (hw % lane_tile) != 0

    def kernel(x_ref, min_ref, max_ref):
        @pl.when((pl.program_id(0) == 0) & (pl.program_id(1) == 0))
        def _init():
            min_ref[...] = jnp.full(min_ref.shape, jnp.inf, min_ref.dtype)
            max_ref[...] = jnp.full(max_ref.shape, -jnp.inf, max_ref.dtype)

        x = x_ref[0].astype(jnp.float32)                      # (3, lane_tile)
        if needs_mask:
            # Edge tile: padded lanes are undefined -> mask them out.
            j = pl.program_id(1)
            lane = jax.lax.broadcasted_iota(jnp.int32, x.shape, 1)
            valid = (j * lane_tile + lane) < hw
            x_lo = jnp.where(valid, x, jnp.inf)
            x_hi = jnp.where(valid, x, -jnp.inf)
        else:
            x_lo = x
            x_hi = x

        tmin = jnp.min(x_lo, axis=1, keepdims=True)           # (3, 1)
        tmax = jnp.max(x_hi, axis=1, keepdims=True)           # (3, 1)
        min_ref[...] = jnp.minimum(min_ref[...], tmin)
        max_ref[...] = jnp.maximum(max_ref[...], tmax)

    return kernel


def _apply_kernel(w_ref, b_ref, x_ref, o_ref):
    """out[c_out] = sum_c W'[c_out,c] * x[c] + b'[c_out]  (9 VPU FMAs / pixel).

    w_ref: (3,3) SMEM, b_ref: (3,) SMEM, x_ref/o_ref: (1, 3, T) VMEM.
    """
    x = x_ref[...].astype(jnp.float32)                        # (1, 3, T)
    chans = [x[:, c, :] for c in range(3)]                    # each (1, T)
    outs = []
    for co in range(3):
        y = w_ref[co, 0] * chans[0]
        y = y + w_ref[co, 1] * chans[1]
        y = y + w_ref[co, 2] * chans[2]
        y = y + b_ref[co]
        outs.append(y)
    o_ref[...] = jnp.stack(outs, axis=1).astype(o_ref.dtype)  # (1, 3, T)


def underwater_color_correction(x, weight, bias, *, lane_tile=None):
    """x: (B, 3, H, W) NCHW float32 (like PyTorch).
    weight: (3, 3) = Conv2d(3,3,1) weight squeezed, bias: (3,)."""
    B, C, H, W = x.shape
    assert C == 3
    HW = H * W
    xr = x.reshape(B, C, HW)  # free: contiguous collapse of the last two dims

    if lane_tile is None:
        lane_tile = _LANE_TILE_TARGET
    lane_tile = min(lane_tile, HW)
    if lane_tile != HW:
        # block last dim must be a multiple of 128 (or the full extent)
        lane_tile = max(128, (lane_tile // 128) * 128)
    nt = pl.cdiv(HW, lane_tile)

    # ---- pass 1: per-channel global min / max --------------------------------
    cmin, cmax = pl.pallas_call(
        _make_minmax_kernel(lane_tile, HW),
        out_shape=(jax.ShapeDtypeStruct((C, 1), jnp.float32),
                   jax.ShapeDtypeStruct((C, 1), jnp.float32)),
        grid=(B, nt),
        in_specs=[pl.BlockSpec((1, C, lane_tile), lambda i, j: (i, 0, j))],
        out_specs=(pl.BlockSpec((C, 1), lambda i, j: (0, 0)),
                   pl.BlockSpec((C, 1), lambda i, j: (0, 0))),
        compiler_params=pltpu.CompilerParams(
            dimension_semantics=("arbitrary", "arbitrary"),
            vmem_limit_bytes=32 * 1024 * 1024),
    )(xr)

    # ---- fold normalization into the 1x1 conv (12 scalars, done once) --------
    #   W @ ((x - cmin) / range) + b  ==  (W * 1/range) @ x + (b - W @ (cmin/range))
    inv = 1.0 / (cmax - cmin)                                  # (3, 1)
    w_eff = (weight * inv.reshape(1, C)).astype(jnp.float32)   # scale input cols
    b_eff = (bias.reshape(C, 1) - weight @ (cmin * inv)).reshape(C).astype(jnp.float32)

    # ---- pass 2: streaming apply (normalize folded in + channel mix) ---------
    out = pl.pallas_call(
        _apply_kernel,
        out_shape=jax.ShapeDtypeStruct((B, C, HW), x.dtype),
        grid=(B, nt),
        in_specs=[
            pl.BlockSpec(memory_space=pltpu.MemorySpace.SMEM),   # W'
            pl.BlockSpec(memory_space=pltpu.MemorySpace.SMEM),   # b'
            pl.BlockSpec((1, C, lane_tile), lambda i, j: (i, 0, j)),
        ],
        out_specs=pl.BlockSpec((1, C, lane_tile), lambda i, j: (i, 0, j)),
        compiler_params=pltpu.CompilerParams(
            dimension_semantics=("parallel", "parallel"),
            vmem_limit_bytes=32 * 1024 * 1024),
    )(w_eff, b_eff, xr)

    return out.reshape(B, C, H, W)


def _reference(x, weight, bias):
    # Pure-JAX reference reproducing the PyTorch forward.
    corrected = []
    for c in range(3):
        ch = x[:, c, :, :]
        cmin = jnp.min(ch)
        cmax = jnp.max(ch)
        corrected.append((ch - cmin) / (cmax - cmin))
    corrected = jnp.stack(corrected, axis=1)                     # (B,3,H,W)
    return jnp.einsum("oc,bchw->bohw", weight, corrected) + bias.reshape(1, 3, 1, 1)


if __name__ == "__main__":
    key = jax.random.PRNGKey(0)
    kx, kw, kb = jax.random.split(key, 3)

    # Deterministic example input (NCHW) and deterministic parameters
    B, C, H, W = 2, 3, 16, 16
    x = jax.random.uniform(kx, (B, C, H, W), dtype=jnp.float32)

    # nn.Conv2d(3, 3, 1, 1, bias=True): weight (3,3,1,1) -> (3,3), bias (3,)
    fan_in = 3
    bound = 1.0 / (fan_in ** 0.5)
    weight = jax.random.uniform(kw, (3, 3), dtype=jnp.float32,
                                minval=-bound, maxval=bound)
    bias = jax.random.uniform(kb, (3,), dtype=jnp.float32,
                              minval=-bound, maxval=bound)

    out = jax.block_until_ready(underwater_color_correction(x, weight, bias))
    ref = _reference(x, weight, bias)
    assert out.shape == (B, C, H, W)
    assert jnp.allclose(out, ref, atol=1e-5, rtol=1e-5), "mismatch vs reference"

    # Second config: lane tile that does not divide H*W -> exercises the masked
    # reduction and partial (edge) output blocks in the apply pass.
    x2 = jax.random.uniform(jax.random.PRNGKey(1), (1, 3, 5, 50), dtype=jnp.float32)
    out2 = jax.block_until_ready(
        underwater_color_correction(x2, weight, bias, lane_tile=128))
    ref2 = _reference(x2, weight, bias)
    assert jnp.allclose(out2, ref2, atol=1e-5, rtol=1e-5), "mismatch (tiled/masked)"

    print("KERNEL_OK")
</pallas_src>

<mosaic_0001>
module attributes {stable_mosaic.version = 11 : i64} {
  func.func @kernel(%arg0: i32, %arg1: i32, %arg2: memref<1x3x256xf32, #tpu.memory_space<vmem>>, %arg3: memref<3x1xf32, #tpu.memory_space<vmem>>, %arg4: memref<3x1xf32, #tpu.memory_space<vmem>>) attributes {dimension_semantics = [#tpu.dimension_semantics<arbitrary>, #tpu.dimension_semantics<arbitrary>], iteration_bounds = array<i64: 2, 1>, scalar_prefetch = 0 : i64, scratch_operands = 0 : i64, tpu.core_type = #tpu.core_type<tc>, window_params = [{transform_indices = @transform_0, window_bounds = array<i64: 1, 3, 256>}, {pipeline_mode = #tpu.pipeline_mode<synchronous>, transform_indices = @transform_1, window_bounds = array<i64: 3, 1>}, {pipeline_mode = #tpu.pipeline_mode<synchronous>, transform_indices = @transform_2, window_bounds = array<i64: 3, 1>}]} {
    %c0_i32 = arith.constant 0 : i32
    %0 = arith.cmpi eq, %arg0, %c0_i32 : i32
    %c0_i32_0 = arith.constant 0 : i32
    %1 = arith.cmpi eq, %arg1, %c0_i32_0 : i32
    %2 = arith.andi %0, %1 : i1
    %3 = arith.extui %2 : i1 to i32
    %c0_i32_1 = arith.constant 0 : i32
    %4 = arith.cmpi ne, %3, %c0_i32_1 : i32
    scf.if %4 {
      %cst_13 = arith.constant 0x7F800000 : f32
      %17 = vector.broadcast %cst_13 : f32 to vector<3x1xf32>
      %c0_14 = arith.constant 0 : index
      %c0_15 = arith.constant 0 : index
      %18 = vector.load %arg3[%c0_14, %c0_15] : memref<3x1xf32, #tpu.memory_space<vmem>>, vector<3x1xf32>
      tpu.vector_store %arg3[%c0_14, %c0_15], %17 {strides = array<i32>} : memref<3x1xf32, #tpu.memory_space<vmem>>, vector<3x1xf32>,
      %cst_16 = arith.constant 0xFF800000 : f32
      %19 = vector.broadcast %cst_16 : f32 to vector<3x1xf32>
      %c0_17 = arith.constant 0 : index
      %c0_18 = arith.constant 0 : index
      %20 = vector.load %arg4[%c0_17, %c0_18] : memref<3x1xf32, #tpu.memory_space<vmem>>, vector<3x1xf32>
      tpu.vector_store %arg4[%c0_17, %c0_18], %19 {strides = array<i32>} : memref<3x1xf32, #tpu.memory_space<vmem>>, vector<3x1xf32>,
    } else {
    }
    %c0 = arith.constant 0 : index
    %c0_2 = arith.constant 0 : index
    %c0_3 = arith.constant 0 : index
    %5 = vector.load %arg2[%c0, %c0_2, %c0_3] : memref<1x3x256xf32, #tpu.memory_space<vmem>>, vector<1x3x256xf32>
    %6 = vector.shape_cast %5 : vector<1x3x256xf32> to vector<3x256xf32>
    %cst = arith.constant dense<0x7F800000> : vector<3xf32>
    %7 = vector.multi_reduction <minimumf>, %6, %cst [1] : vector<3x256xf32> to vector<3xf32>
    %8 = vector.shape_cast %7 : vector<3xf32> to vector<3x1xf32>
    %cst_4 = arith.constant dense<0xFF800000> : vector<3xf32>
    %9 = vector.multi_reduction <maximumf>, %6, %cst_4 [1] : vector<3x256xf32> to vector<3xf32>
    %10 = vector.shape_cast %9 : vector<3xf32> to vector<3x1xf32>
    %c0_5 = arith.constant 0 : index
    %c0_6 = arith.constant 0 : index
    %11 = vector.load %arg3[%c0_5, %c0_6] : memref<3x1xf32, #tpu.memory_space<vmem>>, vector<3x1xf32>
    %12 = arith.minimumf %11, %8 : vector<3x1xf32>
    %c0_7 = arith.constant 0 : index
    %c0_8 = arith.constant 0 : index
    %13 = vector.load %arg3[%c0_7, %c0_8] : memref<3x1xf32, #tpu.memory_space<vmem>>, vector<3x1xf32>
    tpu.vector_store %arg3[%c0_7, %c0_8], %12 {strides = array<i32>} : memref<3x1xf32, #tpu.memory_space<vmem>>, vector<3x1xf32>,
    %c0_9 = arith.constant 0 : index
    %c0_10 = arith.constant 0 : index
    %14 = vector.load %arg4[%c0_9, %c0_10] : memref<3x1xf32, #tpu.memory_space<vmem>>, vector<3x1xf32>
    %15 = arith.maximumf %14, %10 : vector<3x1xf32>
    %c0_11 = arith.constant 0 : index
    %c0_12 = arith.constant 0 : index
    %16 = vector.load %arg4[%c0_11, %c0_12] : memref<3x1xf32, #tpu.memory_space<vmem>>, vector<3x1xf32>
    tpu.vector_store %arg4[%c0_11, %c0_12], %15 {strides = array<i32>} : memref<3x1xf32, #tpu.memory_space<vmem>>, vector<3x1xf32>,
    return
  }
  func.func @transform_0(%arg0: i32, %arg1: i32) -> (i32, i32, i32) {
    %c0_i32 = arith.constant 0 : i32
    %c0_i32_0 = arith.constant 0 : i32
    return %arg0, %c0_i32, %arg1 : i32, i32, i32
  }
  func.func @transform_1(%arg0: i32, %arg1: i32) -> (i32, i32) {
    %c0_i32 = arith.constant 0 : i32
    %c0_i32_0 = arith.constant 0 : i32
    %c0_i32_1 = arith.constant 0 : i32
    return %c0_i32, %c0_i32_0 : i32, i32
  }
  func.func @transform_2(%arg0: i32, %arg1: i32) -> (i32, i32) {
    %c0_i32 = arith.constant 0 : i32
    %c0_i32_0 = arith.constant 0 : i32
    %c0_i32_1 = arith.constant 0 : i32
    return %c0_i32, %c0_i32_0 : i32, i32
  }
}

</mosaic_0001>

<bundles_post_ra>
// kernel: tpu_custom_call.1
= control target key start
LH: loop header
LB: loop body
LE: loop exit
PB: predicated region body
PF: predicated region fallthrough
CT: control target
= control target key end

     0   :  { %s313_s9 = smov 0   ;;  %s315_s10 = smov 0   ;;  %s361_s0 = inlined_call_operand.vmem [shape: f32[2,3,256], index: 0, kind: input, shape index: {}]   ;;  %s362_s1 = inlined_call_operand.vmem [shape: f32[3,1], index: 1, kind: output, shape index: {0}]   ;;  %s363_s2 = inlined_call_operand.vmem [shape: f32[3,1], index: 2, kind: output, shape index: {1}]  }
   0x1   :  { %s317_s11 = smov 0  }
   0x2 LB: > { %s25_s12 = sadd.s32 1, %s290_s10  ;;  %p237_p0 = scmp.ge.s32.totalorder %s294_s11, 1  ;;  %s294_s11 = sphi %s317_s11, %s13_s11   ;;  %s290_s10 = sphi %s315_s10, %s365_s10   ;;  %s286_s9 = sphi %s313_s9, %s364_s9  }
   0x3   : > { %p27_p1 = scmp.ge.s32.totalorder %s25_s12, 2  ;;  %p124_p2 = scmp.lt.s32.totalorder %s294_s11, 3 }
   0x5   : > { %s367_s12 = smov (%p27_p1, %s25_s12), 0  ;;  %p125_p3 = pnand %p237_p0, %p124_p2 }
   0x6   : > { %p146_p4 = scmp.lt.s32.totalorder (!%p125_p3), %s286_s9, 1  ;;  %p155_p5 = scmp.eq.s32.totalorder (!%p125_p3), %s286_s9, 0 }
   0x7   : > { %128 = sbr.rel (%p125_p3) target bundleno = 176 (0xb0), region = 24 }
   0xe   : > { %s369_s9 = smov (!%p146_p4, %s286_s9), 1  ;;  %160 = sbr.rel (!%p155_p5) target bundleno = 21 (0x15), region = 28 }
   0xf   : > { %s243_s13 = sshll.u32 %s369_s9, 3  ;;  %vm161_vm0 = vcmask (%p155_p5), 2048   ;;  %v296_v0 = vmov (%p155_p5), inf   ;;  %v297_v1 = vmov (%p155_p5), -inf  }
  0x10   : > { %s153_s16 = scalar_lea.vmem %s361_s0, %s243_s13  ;;  %162 = vst.msk [vmem:[%s362_s1] sm:$0x7] (%p155_p5), %vm161_vm0, %v296_v0  ;;  %163 = vst.msk [vmem:[%s363_s2] sm:$0x7] (%p155_p5), %vm161_vm0, %v297_v1 }
  0x15 PF: > { %v164_v2 = vld [vmem:[%s153_s16] sm:$0x77]  ;;  %vm168_vm1 = vcmask 1042432   ;;  %vm181_vm2 = vcmask 2048  }
  0x16   : > { %v166_v3 = vcombine.high %v164_v2, %v164_v2  ;;  %v169_v4 = vsel %vm168_vm1, %v164_v2, inf  ;;  %v174_v6 = vsel %vm168_vm1, %v164_v2, -inf }
  0x17   : > { %v179_v10 = vld [vmem:[%s362_s1] sm:$0x7] }
  0x18   : > { %v170_v5 = vsel %vm168_vm1, %v166_v3, inf  ;;  %v175_v7 = vsel %vm168_vm1, %v166_v3, -inf  ;;  %v183_v13 = vld [vmem:[%s363_s2] sm:$0x7] }
  0x19   : > { %v171_v8 = vmin.f32 %v169_v4, %v170_v5  ;;  %v176_v9 = vmax.f32 %v174_v6, %v175_v7 }
  0x1b   : > { %172 = vmin.xlane.f32.xlu0 %v171_v8 }
  0x1f   : > { %177 = vmax.xlane.f32.xlu0 %v176_v9 }
  0xa8   : > { %v173_v11 = vpop.xlane.xlu0 %172 }
  0xa9   : > { %v180_v12 = vmin.f32 %v179_v10, %v173_v11 }
  0xab   : > { %182 = vst.msk [vmem:[%s362_s1] sm:$0x7] %vm181_vm2, %v180_v12 }
  0xac   : > { %v178_v14 = vpop.xlane.xlu0 %177 }
  0xad   : > { %v184_v15 = vmax.f32 %v183_v13, %v178_v14 }
  0xaf   : > { %185 = vst.msk [vmem:[%s363_s2] sm:$0x7] %vm181_vm2, %v184_v15 }
  0xb0 PF: > { %s13_s11 = sadd.s32 1, %s294_s11   ;;  %s364_s9 = smov %s290_s10 }
  0xb1   : > { %p10_p6 = scmp.ge.s32.totalorder %s13_s11, 4   ;;  %s365_s10 = smov %s367_s12 }
  0xb3   :  { %12 = sbr.rel (!%p10_p6) target bundleno = 2 (0x2), region = 62 }

</bundles_post_ra>
